<compile_context>
chip_gen: v6e
topology: v6e:2x2x1
jax: 0.10.0
libtpu: 0.0.40
codegen_flags: <defaults>
</compile_context>

<pallas_src>
import math

import jax
import jax.numpy as jnp
from jax.experimental import pallas as pl
from jax.experimental.pallas import tpu as pltpu


def _affine_kernel(w_ref, b_ref, x_ref, o_ref):
    # w_ref, b_ref: (1,) scalars in SMEM.
    # x_ref, o_ref: (TILE_ROWS, 128) lane-dense tiles in VMEM.
    w = w_ref[0]
    b = b_ref[0]
    o_ref[...] = (x_ref[...] * w + b).astype(o_ref.dtype)


def neta_forward(x, weight, bias, *, tile_rows=2048, lane=128,
                 min_pallas_elems=16384):
    """Pallas equivalent of NetA.forward: fc = nn.Linear(1, 1).

    x:      (batch, 1) float32 (any shape works; Linear(1,1) is elementwise)
    weight: (1, 1)     float32 (PyTorch stores Linear weight as (out, in))
    bias:   (1,)       float32
    """
    orig_shape = x.shape
    n = math.prod(orig_shape)

    w_flat = weight.reshape(-1)   # (1,)
    b_flat = bias.reshape(-1)     # (1,)
    w_s = w_flat[0]
    b_s = b_flat[0]

    # ---- Tiny-batch fast path: pallas_call overhead would dominate. -------
    if n < max(min_pallas_elems, lane * 8):
        return (x * w_s + b_s).astype(x.dtype)

    # ---- Lane-dense tiling of the aligned prefix ---------------------------
    # Number of complete (8, lane) sublane groups available without padding.
    full_rows = (n // (lane * 8)) * 8

    tr = min(tile_rows, full_rows)
    # Give the 'parallel' grid axis >= 2 tiles (v7x has 2 TensorCores), as
    # long as each tile stays reasonably large.
    if full_rows // tr < 2 and full_rows >= 512:
        tr = full_rows // 2
    tr = max(8, (tr // 8) * 8)

    grid_n = full_rows // tr          # whole tiles only; remainder -> tail
    rows = grid_n * tr
    n_main = rows * lane

    x_flat = x.reshape(-1)
    x2d = x_flat[:n_main].reshape(rows, lane)   # aligned prefix: free view

    out2d = pl.pallas_call(
        _affine_kernel,
        out_shape=jax.ShapeDtypeStruct((rows, lane), x.dtype),
        grid=(grid_n,),
        in_specs=[
            pl.BlockSpec(memory_space=pltpu.SMEM),          # weight scalar
            pl.BlockSpec(memory_space=pltpu.SMEM),          # bias scalar
            pl.BlockSpec((tr, lane), lambda i: (i, 0)),     # x tile (VMEM)
        ],
        out_specs=pl.BlockSpec((tr, lane), lambda i: (i, 0)),
        compiler_params=pltpu.CompilerParams(
            dimension_semantics=("parallel",),   # v7x: shard tiles across both TCs
        ),
    )(w_flat, b_flat, x2d)

    out_main = out2d.reshape(-1)

    if n_main == n:
        return out_main.reshape(orig_shape)

    # Small ragged tail (< one tile) finished in plain JAX — avoids padding
    # the whole input and slicing the whole output.
    tail = (x_flat[n_main:] * w_s + b_s).astype(x.dtype)
    return jnp.concatenate([out_main, tail]).reshape(orig_shape)


if __name__ == "__main__":
    key = jax.random.PRNGKey(0)
    kx, kw, kb, kx2, kx3 = jax.random.split(key, 5)

    # Deterministic parameters, same shapes as nn.Linear(1, 1).
    # PyTorch default init is U(-1/sqrt(in), 1/sqrt(in)) = U(-1, 1).
    weight = jax.random.uniform(kw, (1, 1), jnp.float32, minval=-1.0, maxval=1.0)
    bias = jax.random.uniform(kb, (1,), jnp.float32, minval=-1.0, maxval=1.0)

    # 1) Tiny batch consistent with the module (batch=8, in_features=1)
    #    -> plain-JAX fast path (pallas launch overhead would dominate).
    x_small = jax.random.normal(kx, (8, 1), jnp.float32)
    out_small = jax.block_until_ready(neta_forward(x_small, weight, bias))
    ref_small = x_small @ weight.T + bias
    assert out_small.shape == (8, 1)
    assert jnp.allclose(out_small, ref_small, atol=1e-6), "mismatch (fast path)"

    # 2) Aligned batch through the Pallas path; small tile_rows to exercise a
    #    multi-tile pipelined grid (grid = 4) at test size.
    x_big = jax.random.normal(kx2, (65536, 1), jnp.float32)
    out_big = jax.block_until_ready(neta_forward(x_big, weight, bias, tile_rows=128))
    ref_big = x_big @ weight.T + bias
    assert out_big.shape == (65536, 1)
    assert jnp.allclose(out_big, ref_big, atol=1e-6), "mismatch (pallas, aligned)"

    # 3) Unaligned batch: Pallas handles the aligned prefix, plain JAX the tail.
    x_odd = jax.random.normal(kx3, (40000, 1), jnp.float32)
    out_odd = jax.block_until_ready(neta_forward(x_odd, weight, bias, tile_rows=128))
    ref_odd = x_odd @ weight.T + bias
    assert out_odd.shape == (40000, 1)
    assert jnp.allclose(out_odd, ref_odd, atol=1e-6), "mismatch (pallas, ragged tail)"

    print("KERNEL_OK")
</pallas_src>

<mosaic_0001>
module attributes {stable_mosaic.version = 11 : i64} {
  func.func @_affine_kernel(%arg0: i32, %arg1: memref<1xf32, #tpu.memory_space<smem>>, %arg2: memref<1xf32, #tpu.memory_space<smem>>, %arg3: memref<128x128xf32, #tpu.memory_space<vmem>>, %arg4: memref<128x128xf32, #tpu.memory_space<vmem>>) attributes {dimension_semantics = [#tpu.dimension_semantics<parallel>], iteration_bounds = array<i64: 4>, scalar_prefetch = 0 : i64, scratch_operands = 0 : i64, tpu.core_type = #tpu.core_type<tc>, window_params = [{transform_indices = @transform_0, window_bounds = array<i64: 1>}, {transform_indices = @transform_1, window_bounds = array<i64: 1>}, {transform_indices = @transform_2, window_bounds = array<i64: 128, 128>}, {transform_indices = @transform_3, window_bounds = array<i64: 128, 128>}]} {
    %c0 = arith.constant 0 : index
    %0 = memref.load %arg1[%c0] : memref<1xf32, #tpu.memory_space<smem>>
    %c0_0 = arith.constant 0 : index
    %1 = memref.load %arg2[%c0_0] : memref<1xf32, #tpu.memory_space<smem>>
    %c0_1 = arith.constant 0 : index
    %c0_2 = arith.constant 0 : index
    %2 = vector.load %arg3[%c0_1, %c0_2] : memref<128x128xf32, #tpu.memory_space<vmem>>, vector<128x128xf32>
    %3 = vector.broadcast %0 : f32 to vector<128x128xf32>
    %4 = arith.mulf %2, %3 : vector<128x128xf32>
    %5 = vector.broadcast %1 : f32 to vector<128x128xf32>
    %6 = arith.addf %4, %5 : vector<128x128xf32>
    %c0_3 = arith.constant 0 : index
    %c0_4 = arith.constant 0 : index
    %7 = vector.load %arg4[%c0_3, %c0_4] : memref<128x128xf32, #tpu.memory_space<vmem>>, vector<128x128xf32>
    tpu.vector_store %arg4[%c0_3, %c0_4], %6 {strides = array<i32>} : memref<128x128xf32, #tpu.memory_space<vmem>>, vector<128x128xf32>,
    return
  }
  func.func @transform_0(%arg0: i32) -> i32 {
    %c0_i32 = arith.constant 0 : i32
    %c0_i32_0 = arith.constant 0 : i32
    return %c0_i32 : i32
  }
  func.func @transform_1(%arg0: i32) -> i32 {
    %c0_i32 = arith.constant 0 : i32
    %c0_i32_0 = arith.constant 0 : i32
    return %c0_i32 : i32
  }
  func.func @transform_2(%arg0: i32) -> (i32, i32) {
    %c0_i32 = arith.constant 0 : i32
    %c0_i32_0 = arith.constant 0 : i32
    return %arg0, %c0_i32 : i32, i32
  }
  func.func @transform_3(%arg0: i32) -> (i32, i32) {
    %c0_i32 = arith.constant 0 : i32
    %c0_i32_0 = arith.constant 0 : i32
    return %arg0, %c0_i32 : i32, i32
  }
}

</mosaic_0001>

<bundles_post_ra>
// kernel: tpu_custom_call.1
= control target key start
LH: loop header
LB: loop body
LE: loop exit
PB: predicated region body
PF: predicated region fallthrough
CT: control target
= control target key end

     0   :  { %s733_s0 = inlined_call_operand.<no memory space> [shape: f32[1], index: 0, kind: input, shape index: {}]   ;;  %s734_s1 = inlined_call_operand.<no memory space> [shape: f32[1], index: 1, kind: input, shape index: {}]   ;;  %s735_s2 = inlined_call_operand.hbm [shape: f32[512,128], index: 2, kind: input, shape index: {}]   ;;  %s736_s3 = inlined_call_operand.hbm [shape: f32[512,128], index: 3, kind: output, shape index: {}]  }
   0x1   :  { %8 = sst [smem:[#allocation2]] %s733_s0 }
   0x2   :  { %9 = sst [smem:[#allocation3]] %s734_s1 }
   0x3   :  { %10 = vsyncpa [#allocation5], 0 }
   0x4   :  { %12 = vsyncpa [#allocation5 + $0x1], 0 }
   0x5   :  { %13 = vsyncpa [#allocation6], 0 }
   0x6   :  { %15 = vsyncpa [#allocation6 + $0x1], 0  ;;  %s540_s16 = smov 0   ;;  %s542_s17 = smov 0  }
   0x7   :  { %s544_s18 = smov 0   ;;  %s546_s19 = smov 0  }
   0x8 LB: > { %s561_s0 = sadd.s32 4294967295, %s506_s19   ;;  %s348_s1 = sadd.s32 4294967294, %s506_s19   ;;  %s506_s19 = sphi %s546_s19, %s750_s19   ;;  %s502_s18 = sphi %s544_s18, %s749_s18   ;;  %s498_s17 = sphi %s542_s17, %s748_s17   ;;  %s494_s16 = sphi %s540_s16, %s747_s16  }
   0x9   : > { %s565_s20 = sadd.s32 1, %s506_s19   ;;  %s70_s21 = sadd.s32 1, %s502_s18 }
   0xa   : > { %s67_s22 = ssub.s32 %s506_s19, %s565_s20  ;;  %p77_p0 = scmp.ne.s32.totalorder %s502_s18, %s498_s17 }
   0xb   : > { %p68_p1 = scmp.eq.s32.totalorder %s67_s22, 0  ;;  %p78_p2 = scmp.eq.s32.totalorder %s506_s19, 0 }
   0xc   : > { %p83_p3 = scmp.ne.s32.totalorder %s498_s17, %s494_s16  ;;  %p84_p4 = scmp.eq.s32.totalorder %s561_s0, 0 }
   0xd   : > { %s577_s23 = scalar_select %p68_p1, %s502_s18, %s70_s21  }
   0xe   : > { %p579_p5 = por %p78_p2, %p77_p0  ;;  %p583_p6 = por %p84_p4, %p83_p3 }
   0xf   : > { %p107_p7 = scmp.eq.s32.totalorder %s561_s0, 3  ;;  %p113_p8 = scmp.eq.s32.totalorder %s348_s1, 3 }
  0x10   : > { %s740_s25 = scalar_select %p583_p6, 1, 0 }
  0x11   : > { %p376_p9 = scmp.lt.s32.totalorder %s506_s19, 4  ;;  %p589_p10 = por %p107_p7, %p77_p0 }
  0x12   : > { %p593_p11 = por %p113_p8, %p83_p3  ;;  %s139_s28 = sand.u32 1, %s502_s18  }
  0x13   : > { %s741_s26 = scalar_select %p589_p10, 1, 0 }
  0x14   : > { %s742_s27 = scalar_select %p593_p11, 1, 0 }
  0x15   : > { %s362_s29 = sshll.u32 %s506_s19, 11  ;;  %s351_s30 = sshll.u32 %s139_s28, 7 }
  0x16   : > { %s602_s6 = scalar_lea.hbm %s735_s2, %s362_s29  ;;  %s143_s7 = scalar_lea.vmem [#allocation4], %s351_s30 }
  0x17   : > { %s150_s8 = sshll.u32 %s143_s7, 4  ;;  %p606_p12 = pnand %p376_p9, %p579_p5  ;;  %s610_s8 = int_to_ptr.vmem [resolvable:$true] %s150_s8 }
  0x18   : > { %s612_s10 = scalar_lea.sflag [#allocation5], %s139_s28  ;;  %s414_s11 = scalar_lea.hbm %s602_s6, 2048 }
  0x19   : > { %p415_p13 = scmp.ne.s32.totalorder %s602_s6, %s414_s11  ;;  %p416_p0 = pneg %p606_p12 }
  0x1a   : > { %s419_s14 = scalar_lea.hbm %s735_s2, 8192  ;;  %p420_p3 = scmp.lt.s32.totalorder %s602_s6, %s735_s2 }
  0x1b   : > { %p417_p1 = pnand %p416_p0, %p415_p13  ;;  %p421_p4 = scmp.lt.s32.totalorder %s419_s14, %s414_s11 }
  0x1d   : > { %p418_p2 = pneg %p417_p1  ;;  %p422_p5 = por %p421_p4, %p420_p3 }
  0x1f   : > { %p423_p7 = pnand %p422_p5, %p418_p2 }
  0x21   : > { %426 = shalt.err (!%p423_p7)
}
  0x22   : > { %s427_s21 = scalar_lea.vmem %s610_s8, 2048  ;;  %s508_s22 = smov [#allocation4]  }
  0x23   : > { %p428_p8 = scmp.ne.s32.totalorder %s610_s8, %s427_s21  ;;  %s432_s24 = sshll.u32 %s508_s22, 4  ;;  %s433_s24 = int_to_ptr.vmem [resolvable:$false] %s432_s24 }
  0x24   : > { %s434_s28 = scalar_lea.vmem %s433_s24, 4096  ;;  %p435_p1 = scmp.lt.s32.totalorder %s610_s8, %s433_s24 }
  0x25   : > { %p430_p9 = pnand %p428_p8, %p416_p0  ;;  %p436_p11 = scmp.lt.s32.totalorder %s434_s28, %s427_s21 }
  0x27   : > { %p431_p13 = pneg %p430_p9  ;;  %p437_p10 = por %p436_p11, %p435_p1 }
  0x29   : > { %p438_p6 = pnand %p437_p10, %p431_p13 }
  0x2b   : > { %441 = shalt.err (!%p438_p6)
}
  0x2c   : > { %s509_s29 = smov 128   ;;  %s510_s30 = smov 8  }
  0x2d   : > { %371 = dma.hbm_to_vmem [thread:$0]  (!%p606_p12), %s602_s6, 2048, %s610_s8, %s612_s10, %s509_s29, %s509_s29, %s510_s30  }
  0x2e   : > { %p354_p0 = scmp.ge.s32.totalorder %s506_s19, 1  ;;  %p158_p2 = scmp.lt.s32.totalorder %s506_s19, 5 }
  0x30   : > { %p159_p3 = pnand %p354_p0, %p158_p2 }
  0x31   : > { %s636_s4 = sand.u32 (!%p159_p3), 1, %s498_s17   ;;  %p744_p6 = scmp.ne.s32.totalorder (!%p159_p3), %s740_s25, 0 }
  0x32   : > { %162 = sbr.rel (%p159_p3) target bundleno = 89 (0x59), region = 32  ;;  %s355_s5 = sshll.u32 (!%p159_p3), %s636_s4, 7 }
  0x33   : > { %s165_s7 = scalar_lea.sflag (!%p159_p3), [#allocation5], %s636_s4  ;;  %s642_s11 = scalar_lea.vmem (!%p159_p3), [#allocation4], %s355_s5 }
  0x37   : > { %485 = dma.done.wait (%p744_p6), %s165_s7, 2048  }
  0x38   : > { %487 = vsyncadd (%p744_p6), %s165_s7, 4294965248  ;;  %s193_s6 = sld [smem:[#allocation2]]  ;;  %v195_v0 = vld [vmem:[%s642_s11] sm:$0xff]  ;;  %v196_v2 = vld [vmem:[%s642_s11 + $0x8] sm:$0xff]  ;;  %s665_s25 = scalar_lea.vmem [#allocation7], %s355_s5 }
  0x39   : > { %s194_s8 = sld [smem:[#allocation3]]  ;;  %v197_v3 = vld [vmem:[%s642_s11 + $0x10] sm:$0xff]  ;;  %v198_v8 = vld [vmem:[%s642_s11 + $0x18] sm:$0xff]  ;;  %v199_v9 = vld [vmem:[%s642_s11 + $0x20] sm:$0xff]  ;;  %s363_s9 = sshll.u32 %s561_s0, 11 }
  0x3a   : > { %v200_v10 = vld [vmem:[%s642_s11 + $0x28] sm:$0xff]  ;;  %v201_v14 = vld [vmem:[%s642_s11 + $0x30] sm:$0xff]  ;;  %v202_v15 = vld [vmem:[%s642_s11 + $0x38] sm:$0xff]  ;;  %s275_s10 = sshll.u32 %s665_s25, 4  ;;  %s684_s13 = scalar_lea.hbm %s736_s3, %s363_s9  ;;  %s689_s10 = int_to_ptr.vmem [resolvable:$true] %s275_s10 }
  0x3b   : > { %v203_v16 = vld [vmem:[%s642_s11 + $0x40] sm:$0xff]  ;;  %v204_v21 = vld [vmem:[%s642_s11 + $0x48] sm:$0xff]  ;;  %v205_v22 = vld [vmem:[%s642_s11 + $0x50] sm:$0xff]  ;;  %s262_s14 = scalar_lea.sflag [#allocation6], %s636_s4  ;;  %s442_s15 = scalar_lea.vmem %s689_s10, 2048 }
  0x3c   : > { %v206_v23 = vld [vmem:[%s642_s11 + $0x58] sm:$0xff]  ;;  %v207_v28 = vld [vmem:[%s642_s11 + $0x60] sm:$0xff]  ;;  %v208_v29 = vld [vmem:[%s642_s11 + $0x68] sm:$0xff]  ;;  %p443_p10 = scmp.ne.s32.totalorder %s689_s10, %s442_s15  ;;  %p745_p11 = scmp.ne.s32.totalorder %s741_s26, 0 }
  0x3d   : > { %v209_v30 = vld [vmem:[%s642_s11 + $0x70] sm:$0xff]  ;;  %v210_v35 = vld [vmem:[%s642_s11 + $0x78] sm:$0xff]  ;;  %s511_s1 = smov [#allocation7]  }
  0x3e   : > { %v211_v1 = vstv %s193_s6  ;;  %p444_p12 = pnand %p443_p10, %p745_p11  ;;  %s446_s21 = sshll.u32 %s511_s1, 4  ;;  %s447_s21 = int_to_ptr.vmem [resolvable:$false] %s446_s21 }
  0x3f   : > { %v212_v4 = vmul.f32 %v211_v1, %v195_v0  ;;  %v228_v5 = vstv %s194_s8  ;;  %v213_v6 = vmul.f32 %v211_v1, %v196_v2  ;;  %v214_v7 = vmul.f32 %v211_v1, %v197_v3  ;;  %s448_s22 = scalar_lea.vmem %s447_s21, 4096  ;;  %p449_p5 = scmp.lt.s32.totalorder %s689_s10, %s447_s21 }
  0x40   : > { %v215_v11 = vmul.f32 %v211_v1, %v198_v8  ;;  %v216_v12 = vmul.f32 %v211_v1, %v199_v9  ;;  %v217_v13 = vmul.f32 %v211_v1, %v200_v10  ;;  %v218_v20 = vmul.f32 %v211_v1, %v201_v14  ;;  %p445_p4 = pneg %p444_p12  ;;  %p450_p7 = scmp.lt.s32.totalorder %s448_s22, %s442_s15 }
  0x41   : > { %v229_v17 = vadd.f32 %v228_v5, %v212_v4  ;;  %v230_v18 = vadd.f32 %v228_v5, %v213_v6  ;;  %v231_v19 = vadd.f32 %v228_v5, %v214_v7  ;;  %v219_v27 = vmul.f32 %v211_v1, %v202_v15 }
  0x42   : > { %v232_v24 = vadd.f32 %v228_v5, %v215_v11  ;;  %v233_v25 = vadd.f32 %v228_v5, %v216_v12  ;;  %v234_v26 = vadd.f32 %v228_v5, %v217_v13  ;;  %v235_v31 = vadd.f32 %v228_v5, %v218_v20  ;;  %p451_p8 = por %p450_p7, %p449_p5 }
  0x43   : > { %245 = vst [vmem:[%s665_s25] sm:$0xff] %v229_v17  ;;  %246 = vst [vmem:[%s665_s25 + $0x8] sm:$0xff] %v230_v18  ;;  %v220_v32 = vmul.f32 %v211_v1, %v203_v16  ;;  %v221_v33 = vmul.f32 %v211_v1, %v204_v21  ;;  %v222_v34 = vmul.f32 %v211_v1, %v205_v22 }
  0x44   : > { %247 = vst [vmem:[%s665_s25 + $0x10] sm:$0xff] %v231_v19  ;;  %248 = vst [vmem:[%s665_s25 + $0x18] sm:$0xff] %v232_v24  ;;  %v236_v36 = vadd.f32 %v228_v5, %v219_v27  ;;  %v223_v37 = vmul.f32 %v211_v1, %v206_v23  ;;  %v224_v38 = vmul.f32 %v211_v1, %v207_v28  ;;  %p452_p9 = pnand %p451_p8, %p445_p4 }
  0x45   : > { %249 = vst [vmem:[%s665_s25 + $0x20] sm:$0xff] %v233_v25  ;;  %250 = vst [vmem:[%s665_s25 + $0x28] sm:$0xff] %v234_v26  ;;  %v225_v39 = vmul.f32 %v211_v1, %v208_v29  ;;  %v237_v40 = vadd.f32 %v228_v5, %v220_v32  ;;  %v238_v41 = vadd.f32 %v228_v5, %v221_v33 }
  0x46   : > { %251 = vst [vmem:[%s665_s25 + $0x30] sm:$0xff] %v235_v31  ;;  %v239_v42 = vadd.f32 %v228_v5, %v222_v34  ;;  %v226_v43 = vmul.f32 %v211_v1, %v209_v30  ;;  %252 = vst [vmem:[%s665_s25 + $0x38] sm:$0xff] %v236_v36  ;;  %v240_v44 = vadd.f32 %v228_v5, %v223_v37 }
  0x47   : > { %v241_v45 = vadd.f32 %v228_v5, %v224_v38  ;;  %v242_v46 = vadd.f32 %v228_v5, %v225_v39  ;;  %v227_v47 = vmul.f32 %v211_v1, %v210_v35  ;;  %253 = vst [vmem:[%s665_s25 + $0x40] sm:$0xff] %v237_v40  ;;  %254 = vst [vmem:[%s665_s25 + $0x48] sm:$0xff] %v238_v41 }
  0x48   : > { %255 = vst [vmem:[%s665_s25 + $0x50] sm:$0xff] %v239_v42  ;;  %v243_v48 = vadd.f32 %v228_v5, %v226_v43  ;;  %256 = vst [vmem:[%s665_s25 + $0x58] sm:$0xff] %v240_v44 }
  0x49   : > { %257 = vst [vmem:[%s665_s25 + $0x60] sm:$0xff] %v241_v45  ;;  %258 = vst [vmem:[%s665_s25 + $0x68] sm:$0xff] %v242_v46  ;;  %v244_v49 = vadd.f32 %v228_v5, %v227_v47 }
  0x4a   : > { %259 = vst [vmem:[%s665_s25 + $0x70] sm:$0xff] %v243_v48 }
  0x4b   : > { %260 = vst [vmem:[%s665_s25 + $0x78] sm:$0xff] %v244_v49 }
  0x4c   : > { %455 = shalt.err (!%p452_p9)
}
  0x4d   : > { %s456_s24 = scalar_lea.hbm %s684_s13, 2048  ;;  %s460_s30 = scalar_lea.hbm %s736_s3, 8192 }
  0x4e   : > { %p457_p13 = scmp.ne.s32.totalorder %s684_s13, %s456_s24  ;;  %p461_p2 = scmp.lt.s32.totalorder %s684_s13, %s736_s3 }
  0x4f   : > { %p462_p3 = scmp.lt.s32.totalorder %s460_s30, %s456_s24 }
  0x50   : > { %p458_p1 = pnand %p457_p13, %p745_p11 }
  0x51   : > { %p463_p6 = por %p462_p3, %p461_p2 }
  0x52   : > { %p459_p0 = pneg %p458_p1 }
  0x54   : > { %p464_p10 = pnand %p463_p6, %p459_p0 }
  0x56   : > { %467 = shalt.err (!%p464_p10)
}
  0x57   : > { %s512_s11 = smov 128   ;;  %s513_s6 = smov 8  }
  0x58   : > { %366 = dma.vmem_to_hbm [thread:$0]  (%p745_p11), %s689_s10, 2048, %s684_s13, %s262_s14, %s512_s11, %s512_s11, %s513_s6  }
  0x59 PF: > { %p377_p12 = scmp.ge.s32.totalorder %s506_s19, 2  ;;  %s290_s8 = sand.u32 1, %s494_s16  }
  0x5a   : > { %p746_p4 = scmp.ne.s32.totalorder %s742_s27, 0  ;;  %s291_s25 = scalar_lea.sflag [#allocation6], %s290_s8 }
  0x5c   : > { %p373_p5 = pnand %p377_p12, %p746_p4 }
  0x5e   : > { %p374_p7 = pneg %p373_p5 }
  0x60   : > { %489 = dma.done.wait (%p374_p7), %s291_s25, 2048  }
  0x61   : > { %491 = vsyncadd (%p374_p7), %s291_s25, 4294965248  ;;  %p18_p8 = scmp.ge.s32.totalorder %s565_s20, 6   ;;  %s747_s16 = smov %s498_s17 }
  0x62   : > { %s748_s17 = smov %s502_s18  ;;  %s749_s18 = smov %s577_s23 }
  0x63   : > { %s750_s19 = smov %s565_s20  ;;  %20 = sbr.rel (!%p18_p8) target bundleno = 8 (0x8), region = 77 }
  0x68   :  { %296 = vsyncpa [#allocation5], 1 }
  0x69   :  { %298 = vsyncpa [#allocation5 + $0x1], 1 }
  0x6a   :  { %299 = vsyncpa [#allocation6], 1 }
  0x6b   :  { %301 = vsyncpa [#allocation6 + $0x1], 1 }

</bundles_post_ra>
